<compile_context>
chip_gen: v7x
topology: tpu7x:2x2x1
jax: 0.10.0
libtpu: 0.0.40
codegen_flags: <defaults>
</compile_context>

<pallas_src>
import jax
import jax.numpy as jnp
from jax.experimental import pallas as pl
from jax.experimental.pallas import tpu as pltpu

OUTPUT_DIM = 82   # config['output_dim']
BETA = 0.59       # config['beta'] -> initial value of alph

_SUBLANE = 8
_MAX_TB = 8192                       # 6 bufs x 8192 x 128 lanes x 4B ~= 25 MiB VMEM
_VMEM_LIMIT = 48 * 1024 * 1024       # safe on v5e/v6e (128 MiB) and v7x (64 MiB)
_TINY_BYTES = 2 * 1024 * 1024        # below this, XLA fusion beats a custom call


def _fusion_kernel(f1_ref, f2_ref, alph_ref, out_ref):
    # out = f1 * a + f2 * (1 - a)   (exact parity with the PyTorch forward)
    f1 = f1_ref[...]                  # (tb, D)
    f2 = f2_ref[...]                  # (tb, D)
    a = alph_ref[...]                 # (1, D) -> broadcasts over batch (sublanes)
    out_ref[...] = f1 * a + f2 * (1.0 - a)


def weight_classifier1(f1, f2, alph, *, block_rows=_MAX_TB, force_pallas=False):
    """f1, f2: (B, D) float32; alph: (D,) float32. Returns (B, D)."""
    assert f1.shape == f2.shape and f1.ndim == 2
    B, D = f1.shape
    assert alph.shape == (D,)
    alph = alph.astype(f1.dtype)

    # Tiny-problem bypass: the custom-call launch dominates; let XLA fuse it.
    if not force_pallas and (B * D * f1.dtype.itemsize) < _TINY_BYTES:
        return f1 * alph + f2 * (1.0 - alph)

    alph2d = alph.reshape(1, D)

    # ---- batch tiling ------------------------------------------------------
    tb_cap = max(_SUBLANE, (min(block_rows, _MAX_TB) // _SUBLANE) * _SUBLANE)
    if B <= _SUBLANE:
        # Single tiny block; block dim == full array dim satisfies the tiling rule.
        tb = B
    else:
        # At least 2 grid steps so v7x's second TensorCore isn't idle.
        half = ((B + 1) // 2 + _SUBLANE - 1) // _SUBLANE * _SUBLANE
        tb = max(_SUBLANE, min(tb_cap, half))
    grid = (pl.cdiv(B, tb),)

    return pl.pallas_call(
        _fusion_kernel,
        out_shape=jax.ShapeDtypeStruct((B, D), f1.dtype),
        grid=grid,
        in_specs=[
            pl.BlockSpec((tb, D), lambda i: (i, 0)),
            pl.BlockSpec((tb, D), lambda i: (i, 0)),
            pl.BlockSpec((1, D), lambda i: (0, 0)),   # alph: resident block
        ],
        out_specs=pl.BlockSpec((tb, D), lambda i: (i, 0)),
        compiler_params=pltpu.CompilerParams(
            dimension_semantics=("parallel",),         # megacore shard on v7x
            vmem_limit_bytes=_VMEM_LIMIT,
        ),
    )(f1, f2, alph2d)


if __name__ == "__main__":
    key = jax.random.PRNGKey(0)
    k1, k2 = jax.random.split(key)

    batch = 512
    f1 = jax.random.normal(k1, (batch, OUTPUT_DIM), dtype=jnp.float32)
    f2 = jax.random.normal(k2, (batch, OUTPUT_DIM), dtype=jnp.float32)

    # Deterministic parameter init, matching torch.tensor([beta] * 82).
    alph = jnp.full((OUTPUT_DIM,), BETA, dtype=jnp.float32)

    # Reference (same semantics as the PyTorch forward).
    ref = f1 * alph + f2 * (1.0 - alph)

    # Multi-step grid (block_rows=128 -> 4 steps): exercises the pipelined path.
    out = weight_classifier1(f1, f2, alph, block_rows=128, force_pallas=True)
    out = jax.block_until_ready(out)
    assert out.shape == ref.shape
    assert jnp.allclose(out, ref, atol=1e-6, rtol=1e-6), "mismatch vs reference"

    # Non-divisible batch -> partial final block (Pallas clamps/masks it).
    out_p = weight_classifier1(f1[:500], f2[:500], alph, block_rows=128,
                               force_pallas=True)
    out_p = jax.block_until_ready(out_p)
    assert jnp.allclose(out_p, ref[:500], atol=1e-6, rtol=1e-6), "partial-block mismatch"

    # Tiny-batch path (single block, full-extent rows).
    out_s = weight_classifier1(f1[:8], f2[:8], alph, force_pallas=True)
    out_s = jax.block_until_ready(out_s)
    assert jnp.allclose(out_s, ref[:8], atol=1e-6, rtol=1e-6), "small-batch mismatch"

    print("KERNEL_OK")
</pallas_src>

<mosaic_0001>
module attributes {stable_mosaic.version = 11 : i64} {
  func.func @_fusion_kernel(%arg0: i32, %arg1: memref<128x82xf32, #tpu.memory_space<vmem>>, %arg2: memref<128x82xf32, #tpu.memory_space<vmem>>, %arg3: memref<1x82xf32, #tpu.memory_space<vmem>>, %arg4: memref<128x82xf32, #tpu.memory_space<vmem>>) attributes {dimension_semantics = [#tpu.dimension_semantics<parallel>], iteration_bounds = array<i64: 4>, scalar_prefetch = 0 : i64, scratch_operands = 0 : i64, tpu.core_type = #tpu.core_type<tc>, window_params = [{transform_indices = @transform_0, window_bounds = array<i64: 128, 82>}, {transform_indices = @transform_1, window_bounds = array<i64: 128, 82>}, {pipeline_mode = #tpu.pipeline_mode<synchronous>, transform_indices = @transform_2, window_bounds = array<i64: 1, 82>}, {transform_indices = @transform_3, window_bounds = array<i64: 128, 82>}]} {
    %c0 = arith.constant 0 : index
    %c0_0 = arith.constant 0 : index
    %0 = vector.load %arg1[%c0, %c0_0] : memref<128x82xf32, #tpu.memory_space<vmem>>, vector<128x82xf32>
    %c0_1 = arith.constant 0 : index
    %c0_2 = arith.constant 0 : index
    %1 = vector.load %arg2[%c0_1, %c0_2] : memref<128x82xf32, #tpu.memory_space<vmem>>, vector<128x82xf32>
    %c0_3 = arith.constant 0 : index
    %c0_4 = arith.constant 0 : index
    %2 = vector.load %arg3[%c0_3, %c0_4] : memref<1x82xf32, #tpu.memory_space<vmem>>, vector<1x82xf32>
    %3 = vector.broadcast %2 : vector<1x82xf32> to vector<128x82xf32>
    %4 = arith.mulf %0, %3 : vector<128x82xf32>
    %cst = arith.constant 1.000000e+00 : f32
    %5 = vector.broadcast %cst : f32 to vector<1x82xf32>
    %6 = arith.subf %5, %2 : vector<1x82xf32>
    %7 = vector.broadcast %6 : vector<1x82xf32> to vector<128x82xf32>
    %8 = arith.mulf %1, %7 : vector<128x82xf32>
    %9 = arith.addf %4, %8 : vector<128x82xf32>
    %c0_5 = arith.constant 0 : index
    %c0_6 = arith.constant 0 : index
    %10 = vector.load %arg4[%c0_5, %c0_6] : memref<128x82xf32, #tpu.memory_space<vmem>>, vector<128x82xf32>
    tpu.vector_store %arg4[%c0_5, %c0_6], %9 {strides = array<i32>} : memref<128x82xf32, #tpu.memory_space<vmem>>, vector<128x82xf32>,
    return
  }
  func.func @transform_0(%arg0: i32) -> (i32, i32) {
    %c0_i32 = arith.constant 0 : i32
    %c0_i32_0 = arith.constant 0 : i32
    return %arg0, %c0_i32 : i32, i32
  }
  func.func @transform_1(%arg0: i32) -> (i32, i32) {
    %c0_i32 = arith.constant 0 : i32
    %c0_i32_0 = arith.constant 0 : i32
    return %arg0, %c0_i32 : i32, i32
  }
  func.func @transform_2(%arg0: i32) -> (i32, i32) {
    %c0_i32 = arith.constant 0 : i32
    %c0_i32_0 = arith.constant 0 : i32
    %c0_i32_1 = arith.constant 0 : i32
    return %c0_i32, %c0_i32_0 : i32, i32
  }
  func.func @transform_3(%arg0: i32) -> (i32, i32) {
    %c0_i32 = arith.constant 0 : i32
    %c0_i32_0 = arith.constant 0 : i32
    return %arg0, %c0_i32 : i32, i32
  }
}

</mosaic_0001>

<bundles_post_ra>
// kernel: tpu_custom_call.1
= control target key start
LH: loop header
LB: loop body
LE: loop exit
PB: predicated region body
PF: predicated region fallthrough
CT: control target
= control target key end

     0   :  { %s424_s12 = smov 0   ;;  %s553_s0 = inlined_call_operand.vmem [shape: f32[512,82], index: 0, kind: input, shape index: {}]   ;;  %s554_s1 = inlined_call_operand.vmem [shape: f32[512,82], index: 1, kind: input, shape index: {}]   ;;  %s555_s2 = inlined_call_operand.vmem [shape: f32[1,82], index: 2, kind: input, shape index: {}]   ;;  %s556_s3 = inlined_call_operand.vmem [shape: f32[512,82], index: 3, kind: output, shape index: {}]  }
   0x1 LB: > { %s375_s13 = sadd.s32 4294967295, %s402_s12   ;;  %p379_p0 = scmp.ge.s32.totalorder %s402_s12, 1  ;;  %s402_s12 = sphi %s424_s12, %s13_s12  }
   0x2   : > { %p149_p1 = scmp.lt.s32.totalorder %s402_s12, 5 }
   0x4   : > { %p150_p2 = pnand %p379_p0, %p149_p1 }
   0x5   : > { %s380_s14 = sshll.u32 (!%p150_p2), %s375_s13, 4  ;;  %v228_v0 = vld [vmem:[%s555_s2] sm:$0x1] (!%p150_p2)  ;;  %v230_v1 = vlaneseq (!%p150_p2)  ;;  %vm290_vm0 = vcmask (!%p150_p2), 670720  }
   0x6   : > { %153 = sbr.rel (%p150_p2) target bundleno = 34 (0x22), region = 32  ;;  %p179_p3 = scmp.lt.s32.totalorder (!%p150_p2), %s380_s14, 63  ;;  %v251_v3 = vsub.f32 (!%p150_p2), 1.0, %v228_v0 }
   0x7   : > { %v231_v2 = vshrl.u32 (!%p150_p2), %v230_v1, 7 }
   0x9   : > { %v232_v4 = vsub.s32 (!%p150_p2), 0, %v231_v2 }
   0xb   : > { %v445_v5 = vrot.slane (!%p150_p2), %v228_v0, %v232_v4  ;;  %v447_v6 = vrot.slane (!%p150_p2), %v251_v3, %v232_v4 }
   0xd   : > { %s558_s14 = smov (!%p179_p3, %s380_s14), 63 }
   0xe   : > { %s381_s17 = sshll.u32 %s558_s14, 3 }
   0xf   : > { %s438_s20 = scalar_lea.vmem %s553_s0, %s381_s17  ;;  %s443_s23 = scalar_lea.vmem %s554_s1, %s381_s17 }
  0x10   : > { %v196_v7 = vld [vmem:[%s438_s20] sm:$0xff]  ;;  %v197_v9 = vld [vmem:[%s438_s20 + $0x8] sm:$0xff]  ;;  %v198_v14 = vld [vmem:[%s438_s20 + $0x10] sm:$0xff]  ;;  %s461_s26 = scalar_lea.vmem %s556_s3, %s381_s17 }
  0x11   : > { %v212_v8 = vld [vmem:[%s443_s23] sm:$0xff]  ;;  %v235_v10 = vmul.f32 %v445_v5, %v196_v7  ;;  %v213_v12 = vld [vmem:[%s443_s23 + $0x8] sm:$0xff]  ;;  %v236_v13 = vmul.f32 %v445_v5, %v197_v9  ;;  %v214_v15 = vld [vmem:[%s443_s23 + $0x10] sm:$0xff]  ;;  %v237_v17 = vmul.f32 %v445_v5, %v198_v14 }
  0x12   : > { %v258_v11 = vmul.f32 %v447_v6, %v212_v8  ;;  %v259_v16 = vmul.f32 %v447_v6, %v213_v12  ;;  %v260_v18 = vmul.f32 %v447_v6, %v214_v15  ;;  %v199_v19 = vld [vmem:[%s438_s20 + $0x18] sm:$0xff]  ;;  %v200_v21 = vld [vmem:[%s438_s20 + $0x20] sm:$0xff]  ;;  %v201_v27 = vld [vmem:[%s438_s20 + $0x28] sm:$0xff] }
  0x13   : > { %v215_v20 = vld [vmem:[%s443_s23 + $0x18] sm:$0xff]  ;;  %v238_v23 = vmul.f32 %v445_v5, %v199_v19  ;;  %v216_v25 = vld [vmem:[%s443_s23 + $0x20] sm:$0xff]  ;;  %v239_v26 = vmul.f32 %v445_v5, %v200_v21  ;;  %v217_v28 = vld [vmem:[%s443_s23 + $0x28] sm:$0xff]  ;;  %v240_v32 = vmul.f32 %v445_v5, %v201_v27 }
  0x14   : > { %v274_v22 = vadd.f32 %v258_v11, %v235_v10  ;;  %v261_v24 = vmul.f32 %v447_v6, %v215_v20  ;;  %v275_v29 = vadd.f32 %v259_v16, %v236_v13  ;;  %v276_v30 = vadd.f32 %v260_v18, %v237_v17  ;;  %v202_v33 = vld [vmem:[%s438_s20 + $0x30] sm:$0xff]  ;;  %v203_v35 = vld [vmem:[%s438_s20 + $0x38] sm:$0xff]  ;;  %v204_v41 = vld [vmem:[%s438_s20 + $0x40] sm:$0xff] }
  0x15   : > { %v262_v31 = vmul.f32 %v447_v6, %v216_v25  ;;  %v218_v34 = vld [vmem:[%s443_s23 + $0x30] sm:$0xff]  ;;  %v263_v37 = vmul.f32 %v447_v6, %v217_v28  ;;  %v241_v38 = vmul.f32 %v445_v5, %v202_v33  ;;  %v219_v40 = vld [vmem:[%s443_s23 + $0x38] sm:$0xff]  ;;  %v220_v42 = vld [vmem:[%s443_s23 + $0x40] sm:$0xff]  ;;  %v242_v44 = vmul.f32 %v445_v5, %v203_v35 }
  0x16   : > { %291 = vst.msk [vmem:[%s461_s26] sm:$0xff] %vm290_vm0, %v274_v22  ;;  %v277_v36 = vadd.f32 %v261_v24, %v238_v23  ;;  %v264_v39 = vmul.f32 %v447_v6, %v218_v34  ;;  %292 = vst.msk [vmem:[%s461_s26 + $0x8] sm:$0xff] %vm290_vm0, %v275_v29  ;;  %v265_v45 = vmul.f32 %v447_v6, %v219_v40  ;;  %v205_v47 = vld [vmem:[%s438_s20 + $0x48] sm:$0xff]  ;;  %v206_v49 = vld [vmem:[%s438_s20 + $0x50] sm:$0xff] }
  0x17   : > { %293 = vst.msk [vmem:[%s461_s26 + $0x10] sm:$0xff] %vm290_vm0, %v276_v30  ;;  %v278_v43 = vadd.f32 %v262_v31, %v239_v26  ;;  %v243_v46 = vmul.f32 %v445_v5, %v204_v41  ;;  %v221_v48 = vld [vmem:[%s443_s23 + $0x48] sm:$0xff]  ;;  %v279_v50 = vadd.f32 %v263_v37, %v240_v32  ;;  %v266_v52 = vmul.f32 %v447_v6, %v220_v42  ;;  %v222_v54 = vld [vmem:[%s443_s23 + $0x50] sm:$0xff]  ;;  %v207_v55 = vld [vmem:[%s438_s20 + $0x58] sm:$0xff] }
  0x18   : > { %294 = vst.msk [vmem:[%s461_s26 + $0x18] sm:$0xff] %vm290_vm0, %v277_v36  ;;  %v280_v51 = vadd.f32 %v264_v39, %v241_v38  ;;  %v244_v53 = vmul.f32 %v445_v5, %v205_v47  ;;  %v223_v56 = vld [vmem:[%s443_s23 + $0x58] sm:$0xff]  ;;  %v281_v57 = vadd.f32 %v265_v45, %v242_v44  ;;  %v267_v58 = vmul.f32 %v447_v6, %v221_v48  ;;  %v208_v61 = vld [vmem:[%s438_s20 + $0x60] sm:$0xff]  ;;  %v209_v63 = vld [vmem:[%s438_s20 + $0x68] sm:$0xff] }
  0x19   : > { %295 = vst.msk [vmem:[%s461_s26 + $0x20] sm:$0xff] %vm290_vm0, %v278_v43  ;;  %v245_v59 = vmul.f32 %v445_v5, %v206_v49  ;;  %v268_v60 = vmul.f32 %v447_v6, %v222_v54  ;;  %v224_v62 = vld [vmem:[%s443_s23 + $0x60] sm:$0xff]  ;;  %296 = vst.msk [vmem:[%s461_s26 + $0x28] sm:$0xff] %vm290_vm0, %v279_v50  ;;  %v282_v0 = vadd.f32 %v266_v52, %v243_v46  ;;  %v225_v4 = vld [vmem:[%s443_s23 + $0x68] sm:$0xff] }
  0x1a   : > { %297 = vst.msk [vmem:[%s461_s26 + $0x30] sm:$0xff] %vm290_vm0, %v280_v51  ;;  %v246_v1 = vmul.f32 %v445_v5, %v207_v55  ;;  %v269_v2 = vmul.f32 %v447_v6, %v223_v56  ;;  %v247_v3 = vmul.f32 %v445_v5, %v208_v61  ;;  %v210_v7 = vld [vmem:[%s438_s20 + $0x70] sm:$0xff]  ;;  %298 = vst.msk [vmem:[%s461_s26 + $0x38] sm:$0xff] %vm290_vm0, %v281_v57  ;;  %v211_v13 = vld [vmem:[%s438_s20 + $0x78] sm:$0xff] }
  0x1b   : > { %v226_v8 = vld [vmem:[%s443_s23 + $0x70] sm:$0xff]  ;;  %v283_v9 = vadd.f32 %v267_v58, %v244_v53  ;;  %v284_v10 = vadd.f32 %v268_v60, %v245_v59  ;;  %v270_v11 = vmul.f32 %v447_v6, %v224_v62  ;;  %v248_v12 = vmul.f32 %v445_v5, %v209_v63  ;;  %v227_v14 = vld [vmem:[%s443_s23 + $0x78] sm:$0xff]  ;;  %299 = vst.msk [vmem:[%s461_s26 + $0x40] sm:$0xff] %vm290_vm0, %v282_v0 }
  0x1c   : > { %v285_v15 = vadd.f32 %v269_v2, %v246_v1  ;;  %v271_v16 = vmul.f32 %v447_v6, %v225_v4  ;;  %v249_v17 = vmul.f32 %v445_v5, %v210_v7  ;;  %v272_v18 = vmul.f32 %v447_v6, %v226_v8 }
  0x1d   : > { %300 = vst.msk [vmem:[%s461_s26 + $0x48] sm:$0xff] %vm290_vm0, %v283_v9  ;;  %301 = vst.msk [vmem:[%s461_s26 + $0x50] sm:$0xff] %vm290_vm0, %v284_v10  ;;  %v286_v19 = vadd.f32 %v270_v11, %v247_v3  ;;  %v250_v20 = vmul.f32 %v445_v5, %v211_v13  ;;  %v273_v21 = vmul.f32 %v447_v6, %v227_v14 }
  0x1e   : > { %302 = vst.msk [vmem:[%s461_s26 + $0x58] sm:$0xff] %vm290_vm0, %v285_v15  ;;  %v287_v22 = vadd.f32 %v271_v16, %v248_v12  ;;  %v288_v23 = vadd.f32 %v272_v18, %v249_v17 }
  0x1f   : > { %303 = vst.msk [vmem:[%s461_s26 + $0x60] sm:$0xff] %vm290_vm0, %v286_v19  ;;  %v289_v24 = vadd.f32 %v273_v21, %v250_v20 }
  0x20   : > { %304 = vst.msk [vmem:[%s461_s26 + $0x68] sm:$0xff] %vm290_vm0, %v287_v22  ;;  %305 = vst.msk [vmem:[%s461_s26 + $0x70] sm:$0xff] %vm290_vm0, %v288_v23 }
  0x21   : > { %306 = vst.msk [vmem:[%s461_s26 + $0x78] sm:$0xff] %vm290_vm0, %v289_v24 }
  0x22 PF: > { %s13_s12 = sadd.s32 1, %s402_s12  }
  0x23   : > { %p10_p4 = scmp.ge.s32.totalorder %s13_s12, 6  }
  0x25   :  { %12 = sbr.rel (!%p10_p4) target bundleno = 1 (0x1), region = 65 }

</bundles_post_ra>
